<compile_context>
chip_gen: v6e
topology: v6e:2x2x1
jax: 0.10.0
libtpu: 0.0.40
codegen_flags: <defaults>
</compile_context>

<pallas_src>
import functools

import jax
import jax.numpy as jnp
import numpy as np
from jax.experimental import pallas as pl
from jax.experimental.pallas import tpu as pltpu


def se_kernel(x_ref, w1t_ref, w2t_ref, o_ref, *, channels_last):
    """One grid step: full SE forward for a block of Bt batches.

    NCHW path:  x_ref / o_ref are (Bt, C, HW)  (C on sublanes, HW on lanes)
    NHWC path:  x_ref / o_ref are (Bt, HW, C)  (HW on sublanes, C on lanes)
    w1t_ref: (C, Cr)  pre-transposed weight of Conv2d(C, C//r, 1, bias=False)
    w2t_ref: (Cr, C)  pre-transposed weight of Conv2d(C//r, C, 1, bias=False)
    """
    spatial_axis = 1 if channels_last else 2

    # ---- Pass 1: AdaptiveAvgPool2d(1) == mean over HW, accumulated in f32 ----
    pooled = jnp.mean(x_ref[...].astype(jnp.float32), axis=spatial_axis)   # (Bt, C)

    # ---- Two 1x1 convs on a 1x1 map == two small MXU matmuls ----
    # Matmul inputs in the weight dtype (bf16 weights -> single-pass bf16 MXU);
    # accumulation stays f32 via preferred_element_type.
    mm_dtype = w1t_ref.dtype
    h = jnp.dot(pooled.astype(mm_dtype), w1t_ref[...],
                preferred_element_type=jnp.float32)                        # (Bt, Cr)
    h = h * jax.nn.sigmoid(h)                                              # SiLU (f32)
    a = jax.nn.sigmoid(
        jnp.dot(h.astype(mm_dtype), w2t_ref[...],
                preferred_element_type=jnp.float32))                       # (Bt, C) f32

    # ---- Pass 2: re-read x and scale by the per-channel attention (f32) ----
    # x is re-read here (kept in I/O dtype until this point), not held live as
    # an f32 upcast across the matmul chain; the scale streams through the VPU.
    # TODO(synk): if a bundle dump ever shows the two x_ref reads CSE'd into a
    # single full-tile live value, chunk this pass with a fori_loop over pl.ds.
    a_b = a[:, None, :] if channels_last else a[:, :, None]
    o_ref[...] = (x_ref[...].astype(jnp.float32) * a_b).astype(o_ref.dtype)


def _se_pallas_call(x3, w1t, w2t, *, block_b, channels_last, vmem_limit,
                    single_buffer_weights):
    B = x3.shape[0]
    C, Cr = w1t.shape
    blk = (block_b,) + tuple(x3.shape[1:])   # (Bt, C, HW) or (Bt, HW, C)

    if single_buffer_weights:
        # Grid-invariant weights: one pipeline buffer is enough (saves VMEM).
        w_specs = [
            pl.BlockSpec((C, Cr), lambda b: (0, 0), pipeline_mode=pl.Buffered(1)),
            pl.BlockSpec((Cr, C), lambda b: (0, 0), pipeline_mode=pl.Buffered(1)),
        ]
    else:
        w_specs = [
            pl.BlockSpec((C, Cr), lambda b: (0, 0)),
            pl.BlockSpec((Cr, C), lambda b: (0, 0)),
        ]

    kernel = functools.partial(se_kernel, channels_last=channels_last)
    return pl.pallas_call(
        kernel,
        out_shape=jax.ShapeDtypeStruct(x3.shape, x3.dtype),
        grid_spec=pltpu.PrefetchScalarGridSpec(
            num_scalar_prefetch=0,
            grid=(B // block_b,),
            in_specs=[pl.BlockSpec(blk, lambda b: (b, 0, 0))] + w_specs,
            out_specs=pl.BlockSpec(blk, lambda b: (b, 0, 0)),
        ),
        compiler_params=pltpu.CompilerParams(
            dimension_semantics=("parallel",),
            vmem_limit_bytes=vmem_limit),
    )(x3, w1t, w2t)


def se_module(x, w1, w2, *, block_b=None, data_format="NCHW"):
    """Squeeze-and-excitation forward (matches the PyTorch SEModule).

    x : (B, C, H, W) if data_format=="NCHW" (PyTorch default) or (B, H, W, C)
        if data_format=="NHWC"; any float dtype (f32 / bf16).
    w1: (C//r, C)  weight of the first 1x1 conv (bias=False), PyTorch layout.
    w2: (C, C//r)  weight of the second 1x1 conv (bias=False), PyTorch layout.
    block_b: batches folded into one grid block; auto-chosen if None.
    """
    if data_format == "NCHW":
        B, C, H, W = x.shape
        channels_last = False
    elif data_format == "NHWC":
        B, H, W, C = x.shape
        channels_last = True
    else:
        raise ValueError(f"unsupported data_format: {data_format}")
    Cr, C_in = w1.shape
    assert C_in == C and w2.shape == (C, Cr), "weight shapes inconsistent with x"
    HW = H * W

    # Flatten H,W -> HW in the *native* layout: a free reshape, no HBM transpose.
    x3 = x.reshape(B, HW, C) if channels_last else x.reshape(B, C, HW)

    # Pre-transpose the tiny 1x1-conv weights once, outside the kernel.
    w1t = jnp.transpose(w1)   # (C, Cr)
    w2t = jnp.transpose(w2)   # (Cr, C)

    # Per-generation VMEM budget: ~75% of physical capacity
    # (128 MiB on v5e/v6e, 64 MiB on v7x).
    try:
        vmem_cap = int(pltpu.get_tpu_info().vmem_capacity_bytes)
    except Exception:
        vmem_cap = 64 << 20
    vmem_budget = (vmem_cap * 3) // 4

    itemsize = x.dtype.itemsize
    per_batch = HW * C * itemsize
    per_batch_f32 = HW * C * 4
    w_bytes = w1t.size * w1t.dtype.itemsize + w2t.size * w2t.dtype.itemsize

    def vmem_needed(bb):
        # double-buffered in/out x blocks + single-buffered weights
        # + f32 elementwise temporaries + slack.
        return 4 * bb * per_batch + 2 * bb * per_batch_f32 + 2 * w_bytes + (2 << 20)

    if block_b is None:
        # Largest divisor of B whose x block is <= ~4 MiB, fits the VMEM
        # budget, and keeps the grid length >= 2 (both v7x TensorCores fed).
        target_blk_bytes = 4 << 20
        block_b = 1
        for d in range(1, B + 1):
            if B % d:
                continue
            if d > 1 and B // d < 2:
                continue
            if d * per_batch > target_blk_bytes:
                continue
            if vmem_needed(d) > vmem_budget:
                continue
            block_b = d
    assert B % block_b == 0, "block_b must divide the batch size"
    # TODO(synk): if even a single batch exceeds the VMEM budget (huge early
    # layers on v7x), sub-tile HW with a two-pass pl.ANY + manual-DMA kernel.

    vmem_limit = int(min(max(vmem_needed(block_b), 32 << 20), vmem_budget))

    try:
        out3 = _se_pallas_call(x3, w1t, w2t, block_b=block_b,
                               channels_last=channels_last,
                               vmem_limit=vmem_limit,
                               single_buffer_weights=True)
    except Exception:
        # Fallback for jax builds where single-buffered inputs
        # (pipeline_mode=pl.Buffered(1)) are unsupported.
        out3 = _se_pallas_call(x3, w1t, w2t, block_b=block_b,
                               channels_last=channels_last,
                               vmem_limit=vmem_limit,
                               single_buffer_weights=False)

    return out3.reshape(x.shape)


def se_reference(x, w1, w2, data_format="NCHW"):
    # Pure-JAX reference mirroring the PyTorch forward (sanity check).
    if data_format == "NCHW":
        pooled = jnp.mean(x, axis=(2, 3))                 # (B, C)
    else:
        pooled = jnp.mean(x, axis=(1, 2))                 # (B, C)
    h = pooled @ w1.T
    h = h * jax.nn.sigmoid(h)                             # SiLU
    a = jax.nn.sigmoid(h @ w2.T)                          # (B, C)
    if data_format == "NCHW":
        return x * a[:, :, None, None]
    return x * a[:, None, None, :]


if __name__ == "__main__":
    # Small shapes consistent with SEModule(ch=8, r=4).
    B, C, H, W = 2, 8, 16, 16
    r = 4
    Cr = C // r

    key = jax.random.PRNGKey(0)
    kx, k1, k2 = jax.random.split(key, 3)

    x = jax.random.normal(kx, (B, C, H, W), dtype=jnp.float32)
    # "Kaiming-ish" init for the 1x1 convs (bias=False), stored as dense
    # (out_ch, in_ch) matrices exactly like PyTorch.
    w1 = jax.random.normal(k1, (Cr, C), dtype=jnp.float32) / np.sqrt(C)
    w2 = jax.random.normal(k2, (C, Cr), dtype=jnp.float32) / np.sqrt(Cr)

    ref = se_reference(x, w1, w2)

    # 1) NCHW (PyTorch-native layout), auto block_b -> grid=(2,), no transposes.
    out = se_module(x, w1, w2)
    jax.block_until_ready(out)
    np.testing.assert_allclose(np.asarray(out), np.asarray(ref),
                               rtol=1e-5, atol=1e-5)

    # 2) Explicit block_b override: both batches folded into one block.
    out2 = se_module(x, w1, w2, block_b=2)
    jax.block_until_ready(out2)
    np.testing.assert_allclose(np.asarray(out2), np.asarray(ref),
                               rtol=1e-5, atol=1e-5)

    # 3) bf16 I/O + bf16 weights: matmuls run in bf16 on the MXU, f32 accum,
    #    scale in f32, single cast at the store.
    out_bf16 = se_module(x.astype(jnp.bfloat16),
                         w1.astype(jnp.bfloat16),
                         w2.astype(jnp.bfloat16))
    jax.block_until_ready(out_bf16)
    np.testing.assert_allclose(np.asarray(out_bf16, dtype=np.float32),
                               np.asarray(ref), rtol=5e-2, atol=5e-2)

    # 4) NHWC activations (channel-last models): in-kernel lane-dense C,
    #    reshape is free, still no wrapper transposes.
    x_nhwc = jnp.transpose(x, (0, 2, 3, 1))
    out_nhwc = se_module(x_nhwc, w1, w2, data_format="NHWC")
    jax.block_until_ready(out_nhwc)
    np.testing.assert_allclose(
        np.asarray(out_nhwc),
        np.asarray(se_reference(x_nhwc, w1, w2, data_format="NHWC")),
        rtol=1e-5, atol=1e-5)

    print("KERNEL_OK")
</pallas_src>

<mosaic_0001>
module attributes {stable_mosaic.version = 11 : i64} {
  func.func @se_kernel(%arg0: i32, %arg1: memref<1x8x256xf32, #tpu.memory_space<vmem>>, %arg2: memref<8x2xf32, #tpu.memory_space<vmem>>, %arg3: memref<2x8xf32, #tpu.memory_space<vmem>>, %arg4: memref<1x8x256xf32, #tpu.memory_space<vmem>>) attributes {dimension_semantics = [#tpu.dimension_semantics<parallel>], iteration_bounds = array<i64: 2>, scalar_prefetch = 0 : i64, scratch_operands = 0 : i64, tpu.core_type = #tpu.core_type<tc>, window_params = [{transform_indices = @transform_0, window_bounds = array<i64: 1, 8, 256>}, {pipeline_mode = #tpu.pipeline_mode<synchronous>, transform_indices = @transform_1, window_bounds = array<i64: 8, 2>}, {pipeline_mode = #tpu.pipeline_mode<synchronous>, transform_indices = @transform_2, window_bounds = array<i64: 2, 8>}, {transform_indices = @transform_3, window_bounds = array<i64: 1, 8, 256>}]} {
    %c0 = arith.constant 0 : index
    %c0_0 = arith.constant 0 : index
    %c0_1 = arith.constant 0 : index
    %0 = vector.load %arg1[%c0, %c0_0, %c0_1] : memref<1x8x256xf32, #tpu.memory_space<vmem>>, vector<1x8x256xf32>
    %cst = arith.constant dense<0.000000e+00> : vector<1x8xf32>
    %1 = vector.multi_reduction <add>, %0, %cst [2] : vector<1x8x256xf32> to vector<1x8xf32>
    %cst_2 = arith.constant 2.560000e+02 : f32
    %2 = vector.broadcast %cst_2 : f32 to vector<1x8xf32>
    %3 = arith.divf %1, %2 : vector<1x8xf32>
    %c0_3 = arith.constant 0 : index
    %c0_4 = arith.constant 0 : index
    %4 = vector.load %arg2[%c0_3, %c0_4] : memref<8x2xf32, #tpu.memory_space<vmem>>, vector<8x2xf32>
    %cst_5 = arith.constant dense<0.000000e+00> : vector<1x2xf32>
    %5 = tpu.matmul %3, %4, %cst_5 {dimension_numbers = #tpu.dot_dimension_numbers<[1], [0], [0], [1], [0, 0, 1, 1], [], []>} : vector<1x8xf32>, vector<8x2xf32>, vector<1x2xf32> -> vector<1x2xf32>
    %6 = arith.negf %5 : vector<1x2xf32>
    %7 = math.exp %6 : vector<1x2xf32>
    %cst_6 = arith.constant 1.000000e+00 : f32
    %8 = vector.broadcast %cst_6 : f32 to vector<1x2xf32>
    %9 = arith.addf %8, %7 : vector<1x2xf32>
    %10 = arith.divf %8, %9 : vector<1x2xf32>
    %11 = arith.mulf %5, %10 : vector<1x2xf32>
    %c0_7 = arith.constant 0 : index
    %c0_8 = arith.constant 0 : index
    %12 = vector.load %arg3[%c0_7, %c0_8] : memref<2x8xf32, #tpu.memory_space<vmem>>, vector<2x8xf32>
    %cst_9 = arith.constant dense<0.000000e+00> : vector<1x8xf32>
    %13 = tpu.matmul %11, %12, %cst_9 {dimension_numbers = #tpu.dot_dimension_numbers<[1], [0], [0], [1], [0, 0, 1, 1], [], []>} : vector<1x2xf32>, vector<2x8xf32>, vector<1x8xf32> -> vector<1x8xf32>
    %14 = arith.negf %13 : vector<1x8xf32>
    %15 = math.exp %14 : vector<1x8xf32>
    %cst_10 = arith.constant 1.000000e+00 : f32
    %16 = vector.broadcast %cst_10 : f32 to vector<1x8xf32>
    %17 = arith.addf %16, %15 : vector<1x8xf32>
    %18 = arith.divf %16, %17 : vector<1x8xf32>
    %19 = vector.shape_cast %18 : vector<1x8xf32> to vector<1x8x1xf32>
    %c0_11 = arith.constant 0 : index
    %c0_12 = arith.constant 0 : index
    %c0_13 = arith.constant 0 : index
    %20 = vector.load %arg1[%c0_11, %c0_12, %c0_13] : memref<1x8x256xf32, #tpu.memory_space<vmem>>, vector<1x8x256xf32>
    %21 = vector.broadcast %19 : vector<1x8x1xf32> to vector<1x8x256xf32>
    %22 = arith.mulf %20, %21 : vector<1x8x256xf32>
    %c0_14 = arith.constant 0 : index
    %c0_15 = arith.constant 0 : index
    %c0_16 = arith.constant 0 : index
    %23 = vector.load %arg4[%c0_14, %c0_15, %c0_16] : memref<1x8x256xf32, #tpu.memory_space<vmem>>, vector<1x8x256xf32>
    tpu.vector_store %arg4[%c0_14, %c0_15, %c0_16], %22 {strides = array<i32>} : memref<1x8x256xf32, #tpu.memory_space<vmem>>, vector<1x8x256xf32>,
    return
  }
  func.func @transform_0(%arg0: i32) -> (i32, i32, i32) {
    %c0_i32 = arith.constant 0 : i32
    %c0_i32_0 = arith.constant 0 : i32
    %c0_i32_1 = arith.constant 0 : i32
    return %arg0, %c0_i32, %c0_i32_0 : i32, i32, i32
  }
  func.func @transform_1(%arg0: i32) -> (i32, i32) {
    %c0_i32 = arith.constant 0 : i32
    %c0_i32_0 = arith.constant 0 : i32
    %c0_i32_1 = arith.constant 0 : i32
    return %c0_i32, %c0_i32_0 : i32, i32
  }
  func.func @transform_2(%arg0: i32) -> (i32, i32) {
    %c0_i32 = arith.constant 0 : i32
    %c0_i32_0 = arith.constant 0 : i32
    %c0_i32_1 = arith.constant 0 : i32
    return %c0_i32, %c0_i32_0 : i32, i32
  }
  func.func @transform_3(%arg0: i32) -> (i32, i32, i32) {
    %c0_i32 = arith.constant 0 : i32
    %c0_i32_0 = arith.constant 0 : i32
    %c0_i32_1 = arith.constant 0 : i32
    return %arg0, %c0_i32, %c0_i32_0 : i32, i32, i32
  }
}

module attributes {stable_mosaic.version = 11 : i64} {
  func.func @se_kernel(%arg0: i32, %arg1: memref<1x8x256xf32, #tpu.memory_space<vmem>>, %arg2: memref<8x2xf32, #tpu.memory_space<vmem>>, %arg3: memref<2x8xf32, #tpu.memory_space<vmem>>, %arg4: memref<1x8x256xf32, #tpu.memory_space<vmem>>) attributes {dimension_semantics = [#tpu.dimension_semantics<parallel>], iteration_bounds = array<i64: 2>, scalar_prefetch = 0 : i64, scratch_operands = 0 : i64, tpu.core_type = #tpu.core_type<tc>, window_params = [{transform_indices = @transform_0, window_bounds = array<i64: 1, 8, 256>}, {pipeline_mode = #tpu.pipeline_mode<synchronous>, transform_indices = @transform_1, window_bounds = array<i64: 8, 2>}, {pipeline_mode = #tpu.pipeline_mode<synchronous>, transform_indices = @transform_2, window_bounds = array<i64: 2, 8>}, {transform_indices = @transform_3, window_bounds = array<i64: 1, 8, 256>}]} {
    %c0 = arith.constant 0 : index
    %c0_0 = arith.constant 0 : index
    %c0_1 = arith.constant 0 : index
    %0 = vector.load %arg1[%c0, %c0_0, %c0_1] : memref<1x8x256xf32, #tpu.memory_space<vmem>>, vector<1x8x256xf32>
    %cst = arith.constant dense<0.000000e+00> : vector<1x8xf32>
    %1 = vector.multi_reduction <add>, %0, %cst [2] : vector<1x8x256xf32> to vector<1x8xf32>
    %cst_2 = arith.constant 2.560000e+02 : f32
    %2 = vector.broadcast %cst_2 : f32 to vector<1x8xf32>
    %3 = arith.divf %1, %2 : vector<1x8xf32>
    %c0_3 = arith.constant 0 : index
    %c0_4 = arith.constant 0 : index
    %4 = vector.load %arg2[%c0_3, %c0_4] : memref<8x2xf32, #tpu.memory_space<vmem>>, vector<8x2xf32>
    %cst_5 = arith.constant dense<0.000000e+00> : vector<1x2xf32>
    %5 = tpu.matmul %3, %4, %cst_5 {dimension_numbers = #tpu.dot_dimension_numbers<[1], [0], [0], [1], [0, 0, 1, 1], [], []>} : vector<1x8xf32>, vector<8x2xf32>, vector<1x2xf32> -> vector<1x2xf32>
    %6 = arith.negf %5 : vector<1x2xf32>
    %7 = math.exp %6 : vector<1x2xf32>
    %cst_6 = arith.constant 1.000000e+00 : f32
    %8 = vector.broadcast %cst_6 : f32 to vector<1x2xf32>
    %9 = arith.addf %8, %7 : vector<1x2xf32>
    %10 = arith.divf %8, %9 : vector<1x2xf32>
    %11 = arith.mulf %5, %10 : vector<1x2xf32>
    %c0_7 = arith.constant 0 : index
    %c0_8 = arith.constant 0 : index
    %12 = vector.load %arg3[%c0_7, %c0_8] : memref<2x8xf32, #tpu.memory_space<vmem>>, vector<2x8xf32>
    %cst_9 = arith.constant dense<0.000000e+00> : vector<1x8xf32>
    %13 = tpu.matmul %11, %12, %cst_9 {dimension_numbers = #tpu.dot_dimension_numbers<[1], [0], [0], [1], [0, 0, 1, 1], [], []>} : vector<1x2xf32>, vector<2x8xf32>, vector<1x8xf32> -> vector<1x8xf32>
    %14 = arith.negf %13 : vector<1x8xf32>
    %15 = math.exp %14 : vector<1x8xf32>
    %cst_10 = arith.constant 1.000000e+00 : f32
    %16 = vector.broadcast %cst_10 : f32 to vector<1x8xf32>
    %17 = arith.addf %16, %15 : vector<1x8xf32>
    %18 = arith.divf %16, %17 : vector<1x8xf32>
    %19 = vector.shape_cast %18 : vector<1x8xf32> to vector<1x8x1xf32>
    %c0_11 = arith.constant 0 : index
    %c0_12 = arith.constant 0 : index
    %c0_13 = arith.constant 0 : index
    %20 = vector.load %arg1[%c0_11, %c0_12, %c0_13] : memref<1x8x256xf32, #tpu.memory_space<vmem>>, vector<1x8x256xf32>
    %21 = vector.broadcast %19 : vector<1x8x1xf32> to vector<1x8x256xf32>
    %22 = arith.mulf %20, %21 : vector<1x8x256xf32>
    %c0_14 = arith.constant 0 : index
    %c0_15 = arith.constant 0 : index
    %c0_16 = arith.constant 0 : index
    %23 = vector.load %arg4[%c0_14, %c0_15, %c0_16] : memref<1x8x256xf32, #tpu.memory_space<vmem>>, vector<1x8x256xf32>
    tpu.vector_store %arg4[%c0_14, %c0_15, %c0_16], %22 {strides = array<i32>} : memref<1x8x256xf32, #tpu.memory_space<vmem>>, vector<1x8x256xf32>,
    return
  }
  func.func @transform_0(%arg0: i32) -> (i32, i32, i32) {
    %c0_i32 = arith.constant 0 : i32
    %c0_i32_0 = arith.constant 0 : i32
    %c0_i32_1 = arith.constant 0 : i32
    return %arg0, %c0_i32, %c0_i32_0 : i32, i32, i32
  }
  func.func @transform_1(%arg0: i32) -> (i32, i32) {
    %c0_i32 = arith.constant 0 : i32
    %c0_i32_0 = arith.constant 0 : i32
    %c0_i32_1 = arith.constant 0 : i32
    return %c0_i32, %c0_i32_0 : i32, i32
  }
  func.func @transform_2(%arg0: i32) -> (i32, i32) {
    %c0_i32 = arith.constant 0 : i32
    %c0_i32_0 = arith.constant 0 : i32
    %c0_i32_1 = arith.constant 0 : i32
    return %c0_i32, %c0_i32_0 : i32, i32
  }
  func.func @transform_3(%arg0: i32) -> (i32, i32, i32) {
    %c0_i32 = arith.constant 0 : i32
    %c0_i32_0 = arith.constant 0 : i32
    %c0_i32_1 = arith.constant 0 : i32
    return %arg0, %c0_i32, %c0_i32_0 : i32, i32, i32
  }
}

</mosaic_0001>

<bundles_post_ra>
// kernel: tpu_custom_call.1
= control target key start
LH: loop header
LB: loop body
LE: loop exit
PB: predicated region body
PF: predicated region fallthrough
CT: control target
= control target key end

     0   :  { %8 = vsyncpa [#allocation3], 0  ;;  %s829_s0 = inlined_call_operand.hbm [shape: f32[2,8,256], index: 0, kind: input, shape index: {}]   ;;  %s830_s1 = inlined_call_operand.vmem [shape: f32[8,2], index: 1, kind: input, shape index: {}]   ;;  %s831_s2 = inlined_call_operand.vmem [shape: f32[2,8], index: 2, kind: input, shape index: {}]   ;;  %s832_s3 = inlined_call_operand.hbm [shape: f32[2,8,256], index: 3, kind: output, shape index: {}]  }
   0x1   :  { %10 = vsyncpa [#allocation3 + $0x1], 0 }
   0x2   :  { %11 = vsyncpa [#allocation4], 0 }
   0x3   :  { %13 = vsyncpa [#allocation4 + $0x1], 0  ;;  %s672_s12 = smov 0   ;;  %s674_s13 = smov 0  }
   0x4   :  { %s676_s14 = smov 0   ;;  %s678_s15 = smov 0  }
   0x5 LB: > { %s693_s16 = sadd.s32 4294967295, %s646_s15   ;;  %s463_s17 = sadd.s32 4294967294, %s646_s15   ;;  %s646_s15 = sphi %s678_s15, %s849_s15   ;;  %s642_s14 = sphi %s676_s14, %s848_s14   ;;  %s638_s13 = sphi %s674_s13, %s847_s13   ;;  %s634_s12 = sphi %s672_s12, %s846_s12  }
   0x6   : > { %s697_s18 = sadd.s32 1, %s646_s15   ;;  %s26_s19 = sadd.s32 1, %s642_s14 }
   0x7   : > { %s23_s20 = ssub.s32 %s646_s15, %s697_s18  ;;  %p33_p0 = scmp.ne.s32.totalorder %s642_s14, %s638_s13 }
   0x8   : > { %p24_p1 = scmp.eq.s32.totalorder %s23_s20, 0  ;;  %p34_p2 = scmp.eq.s32.totalorder %s646_s15, 0 }
   0x9   : > { %p39_p3 = scmp.ne.s32.totalorder %s638_s13, %s634_s12  ;;  %p40_p4 = scmp.eq.s32.totalorder %s693_s16, 0 }
   0xa   : > { %s709_s21 = scalar_select %p24_p1, %s642_s14, %s26_s19  }
   0xb   : > { %p711_p5 = por %p34_p2, %p33_p0  ;;  %p715_p6 = por %p40_p4, %p39_p3 }
   0xc   : > { %p105_p7 = scmp.eq.s32.totalorder %s693_s16, 1  ;;  %p111_p8 = scmp.eq.s32.totalorder %s463_s17, 1 }
   0xd   : > { %s836_s23 = scalar_select %p715_p6, 1, 0 }
   0xe   : > { %p510_p10 = scmp.lt.s32.totalorder %s646_s15, 2  ;;  %p722_p11 = por %p105_p7, %p33_p0 }
   0xf   : > { %p726_p12 = por %p111_p8, %p39_p3  ;;  %s137_s26 = sand.u32 1, %s642_s14  }
  0x10   : > { %s837_s24 = scalar_select %p722_p11, 1, 0 }
  0x11   : > { %s838_s25 = scalar_select %p726_p12, 1, 0 }
  0x12   : > { %s482_s27 = sshll.u32 %s646_s15, 8  ;;  %s466_s28 = sshll.u32 %s137_s26, 4 }
  0x13   : > { %s735_s4 = scalar_lea.hbm %s829_s0, %s482_s27  ;;  %s141_s5 = scalar_lea.vmem [#allocation2], %s466_s28 }
  0x14   : > { %s149_s6 = sshll.u32 %s141_s5, 4  ;;  %p739_p13 = pnand %p510_p10, %p711_p5  ;;  %s743_s6 = int_to_ptr.vmem [resolvable:$true] %s149_s6 }
  0x15   : > { %s138_s8 = scalar_lea.sflag [#allocation3], %s137_s26  ;;  %s554_s9 = scalar_lea.hbm %s735_s4, 256 }
  0x16   : > { %p555_p2 = scmp.ne.s32.totalorder %s735_s4, %s554_s9  ;;  %p556_p3 = pneg %p739_p13 }
  0x17   : > { %s559_s17 = scalar_lea.hbm %s829_s0, 512  ;;  %p560_p5 = scmp.lt.s32.totalorder %s735_s4, %s829_s0 }
  0x18   : > { %p557_p4 = pnand %p556_p3, %p555_p2  ;;  %p561_p8 = scmp.lt.s32.totalorder %s559_s17, %s554_s9 }
  0x1a   : > { %p558_p7 = pneg %p557_p4  ;;  %p562_p10 = por %p561_p8, %p560_p5 }
  0x1c   : > { %p563_p9 = pnand %p562_p10, %p558_p7 }
  0x1e   : > { %566 = shalt.err (!%p563_p9)
}
  0x1f   : > { %s567_s22 = scalar_lea.vmem %s743_s6, 256  ;;  %s648_s26 = smov [#allocation2]  }
  0x20   : > { %p568_p0 = scmp.ne.s32.totalorder %s743_s6, %s567_s22  ;;  %s572_s27 = sshll.u32 %s648_s26, 4  ;;  %s573_s27 = int_to_ptr.vmem [resolvable:$false] %s572_s27 }
  0x21   : > { %s574_s28 = scalar_lea.vmem %s573_s27, 512  ;;  %p575_p4 = scmp.lt.s32.totalorder %s743_s6, %s573_s27 }
  0x22   : > { %p570_p1 = pnand %p568_p0, %p556_p3  ;;  %p576_p12 = scmp.lt.s32.totalorder %s574_s28, %s567_s22 }
  0x24   : > { %p571_p2 = pneg %p570_p1  ;;  %p577_p11 = por %p576_p12, %p575_p4 }
  0x26   : > { %p578_p6 = pnand %p577_p11, %p571_p2 }
  0x28   : > { %581 = shalt.err (!%p578_p6)
}
  0x29   : > { %505 = dma.hbm_to_vmem [thread:$0]  (!%p739_p13), %s735_s4, 256, %s743_s6, %s138_s8  }
  0x2a   : > { %p840_p9 = scmp.lt.s32.totalorder %s646_s15, 3  ;;  %p841_p7 = scmp.ge.s32.totalorder %s646_s15, 1 }
  0x2c   : > { %p155_p0 = pnand %p841_p7, %p840_p9 }
  0x2d   : > { %s770_s29 = sand.u32 (!%p155_p0), 1, %s638_s13   ;;  %p842_p6 = scmp.ne.s32.totalorder (!%p155_p0), %s836_s23, 0 }
  0x2e   : > { %158 = sbr.rel (%p155_p0) target bundleno = 781 (0x30d), region = 32  ;;  %s470_s30 = sshll.u32 (!%p155_p0), %s770_s29, 4 }
  0x2f   : > { %s161_s5 = scalar_lea.sflag (!%p155_p0), [#allocation3], %s770_s29  ;;  %s164_s7 = scalar_lea.vmem (!%p155_p0), [#allocation2], %s470_s30 }
  0x33   : > { %625 = dma.done.wait (%p842_p6), %s161_s5, 256  }
  0x34   : > { %627 = vsyncadd (%p842_p6), %s161_s5, 4294967040  ;;  %v187_v0 = vld [vmem:[%s164_s7] sm:$0xff]  ;;  %v188_v1 = vld [vmem:[%s164_s7 + $0x8] sm:$0xff]  ;;  %v649_v3 = vmov 0.0   ;;  %vm650_vm0 = vmmov 0   ;;  %v196_v5 = vlaneseq  ;;  %vm202_vm1 = vcmask 64512  }
  0x35   : > { %v189_v2 = vadd.f32 %v188_v1, %v187_v0  ;;  %488 = vmatprep.subr.mxu0 %v649_v3  ;;  %v194_v4 = vld [vmem:[%s830_s1] sm:$0xff]  ;;  %493 = vmatprep.subr.mxu1 %v649_v3  ;;  %vm287_vm2 = vcmask 1041408   ;;  %vm283_vm3 = vcmask 15360   ;;  %s483_s9 = sshll.u32 %s693_s16, 8  ;;  %s186_s10 = scalar_lea.vmem [#allocation5], %s470_s30 }
  0x36   : > { %489 = vmatpush3.msra.mxu0 %v194_v4  ;;  %490 = vmatprep.mubr.msk.f32.mxu0 %vm650_vm0, %v649_v3  ;;  %v197_v6 = vand.u32 127, %v196_v5  ;;  %v199_v7 = vshrl.u32 %v196_v5, 7  ;;  %v282_v12 = vld [vmem:[%s831_s2] sm:$0x3]  ;;  %s393_s11 = sshll.u32 %s186_s10, 4  ;;  %s792_s20 = scalar_lea.hbm %s832_s3, %s483_s9  ;;  %s394_s11 = int_to_ptr.vmem [resolvable:$true] %s393_s11 }
  0x37   : > { %190 = vadd.xlane.f32.xlu0 %v189_v2  ;;  %495 = vmatprep.mubr.msk.f32.mxu1 %vm650_vm0, %v649_v3  ;;  %s379_s22 = scalar_lea.sflag [#allocation4], %s770_s29  ;;  %s582_s26 = scalar_lea.vmem %s394_s11, 256 }
  0x38   : > { %v200_v8 = vsub.s32 %v197_v6, %v199_v7  ;;  %494 = vmatpush3.msk.msra.mxu1 %vm287_vm2, %v282_v12  ;;  %v369_v25 = vsub.s32 0, %v199_v7  ;;  %p583_p11 = scmp.ne.s32.totalorder %s394_s11, %s582_s26  ;;  %p843_p12 = scmp.ne.s32.totalorder %s837_s24, 0 }
  0x39   : > { %s651_s16 = smov [#allocation5]  }
  0x3a   : > { %p584_p13 = pnand %p583_p11, %p843_p12  ;;  %s586_s27 = sshll.u32 %s651_s16, 4  ;;  %s587_s27 = int_to_ptr.vmem [resolvable:$false] %s586_s27 }
  0x3b   : > { %s588_s28 = scalar_lea.vmem %s587_s27, 512  ;;  %p589_p3 = scmp.lt.s32.totalorder %s394_s11, %s587_s27 }
  0x3c   : > { %p585_p1 = pneg %p584_p13  ;;  %p590_p5 = scmp.lt.s32.totalorder %s588_s28, %s582_s26 }
  0x3e   : > { %p591_p8 = por %p590_p5, %p589_p3 }
  0x40   : > { %p592_p10 = pnand %p591_p8, %p585_p1 }
  0xc0   : > { %v191_v9 = vpop.xlane.xlu0 %190 }
  0xc1   : > { %v193_v10 = vmul.f32 0.00390625, %v191_v9 }
  0xc3   : > { %v201_v11 = vrot.slane %v193_v10, %v200_v8 }
  0xc5   : > { %491 = vmatmul.mubr.msk.f32.vlgmr.msra.gmra.mxu0 %vm202_vm1, %v201_v11 }
 0x185   : > { %v271_v13 = vpop.f32.mrf.mxu0 }
 0x186   : > { %v473_v14 = vmul.f32 -1.442695, %v271_v13 }
 0x187   : > { %v492_v15 = vpop.f32.mrf.mxu0 }
 0x188   : > { %546 = vpow2.f32 %v473_v14 }
 0x195   : > { %v547_v16 = vpop.eup %546 }
 0x196   : > { %v278_v17 = vadd.f32 1.0, %v547_v16 }
 0x198   : > { %548 = vrcp.f32 %v278_v17 }
 0x1a5   : > { %v549_v18 = vpop.eup %548 }
 0x1a6   : > { %v281_v19 = vmul.f32 %v549_v18, %v271_v13 }
 0x1a8   : > { %496 = vmatmul.mubr.msk.f32.vlgmr.msra.gmra.mxu1 %vm283_vm3, %v281_v19 }
 0x268   : > { %v357_v20 = vpop.f32.mrf.mxu1 }
 0x269   : > { %v476_v21 = vmul.f32 -1.442695, %v357_v20 }
 0x26a   : > { %v497_v22 = vpop.f32.mrf.mxu1 }
 0x26b   : > { %550 = vpow2.f32 %v476_v21 }
 0x278   : > { %v551_v23 = vpop.eup %550 }
 0x279   : > { %v364_v24 = vadd.f32 1.0, %v551_v23 }
 0x27b   : > { %552 = vrcp.f32 %v364_v24 }
 0x288   : > { %v553_v26 = vpop.eup %552 }
 0x289   : > { %v370_v27 = vrot.slane %v553_v26, %v369_v25 }
 0x28b   : > { %372 = vbcast.lane.b32.xlu0 %v370_v27, 256 }
 0x2fd   : > { %v373_v28 = vpop.permute.xlu0 %372 }
 0x2fe   : > { %v374_v29 = vmul.f32 %v373_v28, %v187_v0  ;;  %v375_v30 = vmul.f32 %v373_v28, %v188_v1 }
 0x300   : > { %376 = vst [vmem:[%s186_s10] sm:$0xff] %v374_v29  ;;  %377 = vst [vmem:[%s186_s10 + $0x8] sm:$0xff] %v375_v30 }
 0x301   : > { %595 = shalt.err (!%p592_p10)
}
 0x302   : > { %s596_s30 = scalar_lea.hbm %s792_s20, 256  ;;  %s600_s7 = scalar_lea.hbm %s832_s3, 512 }
 0x303   : > { %p597_p2 = scmp.ne.s32.totalorder %s792_s20, %s596_s30  ;;  %p601_p7 = scmp.lt.s32.totalorder %s792_s20, %s832_s3 }
 0x304   : > { %p602_p0 = scmp.lt.s32.totalorder %s600_s7, %s596_s30 }
 0x305   : > { %p598_p4 = pnand %p597_p2, %p843_p12 }
 0x306   : > { %p603_p6 = por %p602_p0, %p601_p7 }
 0x307   : > { %p599_p9 = pneg %p598_p4 }
 0x309   : > { %p604_p11 = pnand %p603_p6, %p599_p9 }
 0x30b   : > { %607 = shalt.err (!%p604_p11)
}
 0x30c   : > { %500 = dma.vmem_to_hbm [thread:$0]  (%p843_p12), %s394_s11, 256, %s792_s20, %s379_s22  }
 0x30d PF: > { %s405_s23 = sand.u32 1, %s634_s12   ;;  %p844_p13 = scmp.ne.s32.totalorder %s838_s25, 0 }
 0x30e   : > { %p845_p1 = scmp.ge.s32.totalorder %s646_s15, 2  ;;  %s406_s8 = scalar_lea.sflag [#allocation4], %s405_s23 }
 0x310   : > { %p507_p3 = pnand %p845_p1, %p844_p13 }
 0x312   : > { %p508_p5 = pneg %p507_p3 }
 0x314   : > { %629 = dma.done.wait (%p508_p5), %s406_s8, 256  }
 0x315   : > { %631 = vsyncadd (%p508_p5), %s406_s8, 4294967040  ;;  %p16_p8 = scmp.ge.s32.totalorder %s697_s18, 4   ;;  %s846_s12 = smov %s638_s13 }
 0x316   : > { %s847_s13 = smov %s642_s14  ;;  %s848_s14 = smov %s709_s21 }
 0x317   : > { %s849_s15 = smov %s697_s18  ;;  %18 = sbr.rel (!%p16_p8) target bundleno = 5 (0x5), region = 77 }
 0x31c   :  { %411 = vsyncpa [#allocation3], 1 }
 0x31d   :  { %413 = vsyncpa [#allocation3 + $0x1], 1 }
 0x31e   :  { %414 = vsyncpa [#allocation4], 1 }
 0x31f   :  { %416 = vsyncpa [#allocation4 + $0x1], 1 }

// kernel: tpu_custom_call.1
= control target key start
LH: loop header
LB: loop body
LE: loop exit
PB: predicated region body
PF: predicated region fallthrough
CT: control target
= control target key end

     0   :  { %8 = vsyncpa [#allocation3], 0  ;;  %s829_s0 = inlined_call_operand.hbm [shape: f32[2,8,256], index: 0, kind: input, shape index: {}]   ;;  %s830_s1 = inlined_call_operand.vmem [shape: f32[8,2], index: 1, kind: input, shape index: {}]   ;;  %s831_s2 = inlined_call_operand.vmem [shape: f32[2,8], index: 2, kind: input, shape index: {}]   ;;  %s832_s3 = inlined_call_operand.hbm [shape: f32[2,8,256], index: 3, kind: output, shape index: {}]  }
   0x1   :  { %10 = vsyncpa [#allocation3 + $0x1], 0 }
   0x2   :  { %11 = vsyncpa [#allocation4], 0 }
   0x3   :  { %13 = vsyncpa [#allocation4 + $0x1], 0  ;;  %s672_s12 = smov 0   ;;  %s674_s13 = smov 0  }
   0x4   :  { %s676_s14 = smov 0   ;;  %s678_s15 = smov 0  }
   0x5 LB: > { %s693_s16 = sadd.s32 4294967295, %s646_s15   ;;  %s463_s17 = sadd.s32 4294967294, %s646_s15   ;;  %s646_s15 = sphi %s678_s15, %s849_s15   ;;  %s642_s14 = sphi %s676_s14, %s848_s14   ;;  %s638_s13 = sphi %s674_s13, %s847_s13   ;;  %s634_s12 = sphi %s672_s12, %s846_s12  }
   0x6   : > { %s697_s18 = sadd.s32 1, %s646_s15   ;;  %s26_s19 = sadd.s32 1, %s642_s14 }
   0x7   : > { %s23_s20 = ssub.s32 %s646_s15, %s697_s18  ;;  %p33_p0 = scmp.ne.s32.totalorder %s642_s14, %s638_s13 }
   0x8   : > { %p24_p1 = scmp.eq.s32.totalorder %s23_s20, 0  ;;  %p34_p2 = scmp.eq.s32.totalorder %s646_s15, 0 }
   0x9   : > { %p39_p3 = scmp.ne.s32.totalorder %s638_s13, %s634_s12  ;;  %p40_p4 = scmp.eq.s32.totalorder %s693_s16, 0 }
   0xa   : > { %s709_s21 = scalar_select %p24_p1, %s642_s14, %s26_s19  }
   0xb   : > { %p711_p5 = por %p34_p2, %p33_p0  ;;  %p715_p6 = por %p40_p4, %p39_p3 }
   0xc   : > { %p105_p7 = scmp.eq.s32.totalorder %s693_s16, 1  ;;  %p111_p8 = scmp.eq.s32.totalorder %s463_s17, 1 }
   0xd   : > { %s836_s23 = scalar_select %p715_p6, 1, 0 }
   0xe   : > { %p510_p10 = scmp.lt.s32.totalorder %s646_s15, 2  ;;  %p722_p11 = por %p105_p7, %p33_p0 }
   0xf   : > { %p726_p12 = por %p111_p8, %p39_p3  ;;  %s137_s26 = sand.u32 1, %s642_s14  }
  0x10   : > { %s837_s24 = scalar_select %p722_p11, 1, 0 }
  0x11   : > { %s838_s25 = scalar_select %p726_p12, 1, 0 }
  0x12   : > { %s482_s27 = sshll.u32 %s646_s15, 8  ;;  %s466_s28 = sshll.u32 %s137_s26, 4 }
  0x13   : > { %s735_s4 = scalar_lea.hbm %s829_s0, %s482_s27  ;;  %s141_s5 = scalar_lea.vmem [#allocation2], %s466_s28 }
  0x14   : > { %s149_s6 = sshll.u32 %s141_s5, 4  ;;  %p739_p13 = pnand %p510_p10, %p711_p5  ;;  %s743_s6 = int_to_ptr.vmem [resolvable:$true] %s149_s6 }
  0x15   : > { %s138_s8 = scalar_lea.sflag [#allocation3], %s137_s26  ;;  %s554_s9 = scalar_lea.hbm %s735_s4, 256 }
  0x16   : > { %p555_p2 = scmp.ne.s32.totalorder %s735_s4, %s554_s9  ;;  %p556_p3 = pneg %p739_p13 }
  0x17   : > { %s559_s17 = scalar_lea.hbm %s829_s0, 512  ;;  %p560_p5 = scmp.lt.s32.totalorder %s735_s4, %s829_s0 }
  0x18   : > { %p557_p4 = pnand %p556_p3, %p555_p2  ;;  %p561_p8 = scmp.lt.s32.totalorder %s559_s17, %s554_s9 }
  0x1a   : > { %p558_p7 = pneg %p557_p4  ;;  %p562_p10 = por %p561_p8, %p560_p5 }
  0x1c   : > { %p563_p9 = pnand %p562_p10, %p558_p7 }
  0x1e   : > { %566 = shalt.err (!%p563_p9)
}
  0x1f   : > { %s567_s22 = scalar_lea.vmem %s743_s6, 256  ;;  %s648_s26 = smov [#allocation2]  }
  0x20   : > { %p568_p0 = scmp.ne.s32.totalorder %s743_s6, %s567_s22  ;;  %s572_s27 = sshll.u32 %s648_s26, 4  ;;  %s573_s27 = int_to_ptr.vmem [resolvable:$false] %s572_s27 }
  0x21   : > { %s574_s28 = scalar_lea.vmem %s573_s27, 512  ;;  %p575_p4 = scmp.lt.s32.totalorder %s743_s6, %s573_s27 }
  0x22   : > { %p570_p1 = pnand %p568_p0, %p556_p3  ;;  %p576_p12 = scmp.lt.s32.totalorder %s574_s28, %s567_s22 }
  0x24   : > { %p571_p2 = pneg %p570_p1  ;;  %p577_p11 = por %p576_p12, %p575_p4 }
  0x26   : > { %p578_p6 = pnand %p577_p11, %p571_p2 }
  0x28   : > { %581 = shalt.err (!%p578_p6)
}
  0x29   : > { %505 = dma.hbm_to_vmem [thread:$0]  (!%p739_p13), %s735_s4, 256, %s743_s6, %s138_s8  }
  0x2a   : > { %p840_p9 = scmp.lt.s32.totalorder %s646_s15, 3  ;;  %p841_p7 = scmp.ge.s32.totalorder %s646_s15, 1 }
  0x2c   : > { %p155_p0 = pnand %p841_p7, %p840_p9 }
  0x2d   : > { %s770_s29 = sand.u32 (!%p155_p0), 1, %s638_s13   ;;  %p842_p6 = scmp.ne.s32.totalorder (!%p155_p0), %s836_s23, 0 }
  0x2e   : > { %158 = sbr.rel (%p155_p0) target bundleno = 781 (0x30d), region = 32  ;;  %s470_s30 = sshll.u32 (!%p155_p0), %s770_s29, 4 }
  0x2f   : > { %s161_s5 = scalar_lea.sflag (!%p155_p0), [#allocation3], %s770_s29  ;;  %s164_s7 = scalar_lea.vmem (!%p155_p0), [#allocation2], %s470_s30 }
  0x33   : > { %625 = dma.done.wait (%p842_p6), %s161_s5, 256  }
  0x34   : > { %627 = vsyncadd (%p842_p6), %s161_s5, 4294967040  ;;  %v187_v0 = vld [vmem:[%s164_s7] sm:$0xff]  ;;  %v188_v1 = vld [vmem:[%s164_s7 + $0x8] sm:$0xff]  ;;  %v649_v3 = vmov 0.0   ;;  %vm650_vm0 = vmmov 0   ;;  %v196_v5 = vlaneseq  ;;  %vm202_vm1 = vcmask 64512  }
  0x35   : > { %v189_v2 = vadd.f32 %v188_v1, %v187_v0  ;;  %488 = vmatprep.subr.mxu0 %v649_v3  ;;  %v194_v4 = vld [vmem:[%s830_s1] sm:$0xff]  ;;  %493 = vmatprep.subr.mxu1 %v649_v3  ;;  %vm287_vm2 = vcmask 1041408   ;;  %vm283_vm3 = vcmask 15360   ;;  %s483_s9 = sshll.u32 %s693_s16, 8  ;;  %s186_s10 = scalar_lea.vmem [#allocation5], %s470_s30 }
  0x36   : > { %489 = vmatpush3.msra.mxu0 %v194_v4  ;;  %490 = vmatprep.mubr.msk.f32.mxu0 %vm650_vm0, %v649_v3  ;;  %v197_v6 = vand.u32 127, %v196_v5  ;;  %v199_v7 = vshrl.u32 %v196_v5, 7  ;;  %v282_v12 = vld [vmem:[%s831_s2] sm:$0x3]  ;;  %s393_s11 = sshll.u32 %s186_s10, 4  ;;  %s792_s20 = scalar_lea.hbm %s832_s3, %s483_s9  ;;  %s394_s11 = int_to_ptr.vmem [resolvable:$true] %s393_s11 }
  0x37   : > { %190 = vadd.xlane.f32.xlu0 %v189_v2  ;;  %495 = vmatprep.mubr.msk.f32.mxu1 %vm650_vm0, %v649_v3  ;;  %s379_s22 = scalar_lea.sflag [#allocation4], %s770_s29  ;;  %s582_s26 = scalar_lea.vmem %s394_s11, 256 }
  0x38   : > { %v200_v8 = vsub.s32 %v197_v6, %v199_v7  ;;  %494 = vmatpush3.msk.msra.mxu1 %vm287_vm2, %v282_v12  ;;  %v369_v25 = vsub.s32 0, %v199_v7  ;;  %p583_p11 = scmp.ne.s32.totalorder %s394_s11, %s582_s26  ;;  %p843_p12 = scmp.ne.s32.totalorder %s837_s24, 0 }
  0x39   : > { %s651_s16 = smov [#allocation5]  }
  0x3a   : > { %p584_p13 = pnand %p583_p11, %p843_p12  ;;  %s586_s27 = sshll.u32 %s651_s16, 4  ;;  %s587_s27 = int_to_ptr.vmem [resolvable:$false] %s586_s27 }
  0x3b   : > { %s588_s28 = scalar_lea.vmem %s587_s27, 512  ;;  %p589_p3 = scmp.lt.s32.totalorder %s394_s11, %s587_s27 }
  0x3c   : > { %p585_p1 = pneg %p584_p13  ;;  %p590_p5 = scmp.lt.s32.totalorder %s588_s28, %s582_s26 }
  0x3e   : > { %p591_p8 = por %p590_p5, %p589_p3 }
  0x40   : > { %p592_p10 = pnand %p591_p8, %p585_p1 }
  0xc0   : > { %v191_v9 = vpop.xlane.xlu0 %190 }
  0xc1   : > { %v193_v10 = vmul.f32 0.00390625, %v191_v9 }
  0xc3   : > { %v201_v11 = vrot.slane %v193_v10, %v200_v8 }
  0xc5   : > { %491 = vmatmul.mubr.msk.f32.vlgmr.msra.gmra.mxu0 %vm202_vm1, %v201_v11 }
 0x185   : > { %v271_v13 = vpop.f32.mrf.mxu0 }
 0x186   : > { %v473_v14 = vmul.f32 -1.442695, %v271_v13 }
 0x187   : > { %v492_v15 = vpop.f32.mrf.mxu0 }
 0x188   : > { %546 = vpow2.f32 %v473_v14 }
 0x195   : > { %v547_v16 = vpop.eup %546 }
 0x196   : > { %v278_v17 = vadd.f32 1.0, %v547_v16 }
 0x198   : > { %548 = vrcp.f32 %v278_v17 }
 0x1a5   : > { %v549_v18 = vpop.eup %548 }
 0x1a6   : > { %v281_v19 = vmul.f32 %v549_v18, %v271_v13 }
 0x1a8   : > { %496 = vmatmul.mubr.msk.f32.vlgmr.msra.gmra.mxu1 %vm283_vm3, %v281_v19 }
 0x268   : > { %v357_v20 = vpop.f32.mrf.mxu1 }
 0x269   : > { %v476_v21 = vmul.f32 -1.442695, %v357_v20 }
 0x26a   : > { %v497_v22 = vpop.f32.mrf.mxu1 }
 0x26b   : > { %550 = vpow2.f32 %v476_v21 }
 0x278   : > { %v551_v23 = vpop.eup %550 }
 0x279   : > { %v364_v24 = vadd.f32 1.0, %v551_v23 }
 0x27b   : > { %552 = vrcp.f32 %v364_v24 }
 0x288   : > { %v553_v26 = vpop.eup %552 }
 0x289   : > { %v370_v27 = vrot.slane %v553_v26, %v369_v25 }
 0x28b   : > { %372 = vbcast.lane.b32.xlu0 %v370_v27, 256 }
 0x2fd   : > { %v373_v28 = vpop.permute.xlu0 %372 }
 0x2fe   : > { %v374_v29 = vmul.f32 %v373_v28, %v187_v0  ;;  %v375_v30 = vmul.f32 %v373_v28, %v188_v1 }
 0x300   : > { %376 = vst [vmem:[%s186_s10] sm:$0xff] %v374_v29  ;;  %377 = vst [vmem:[%s186_s10 + $0x8] sm:$0xff] %v375_v30 }
 0x301   : > { %595 = shalt.err (!%p592_p10)
}
 0x302   : > { %s596_s30 = scalar_lea.hbm %s792_s20, 256  ;;  %s600_s7 = scalar_lea.hbm %s832_s3, 512 }
 0x303   : > { %p597_p2 = scmp.ne.s32.totalorder %s792_s20, %s596_s30  ;;  %p601_p7 = scmp.lt.s32.totalorder %s792_s20, %s832_s3 }
 0x304   : > { %p602_p0 = scmp.lt.s32.totalorder %s600_s7, %s596_s30 }
 0x305   : > { %p598_p4 = pnand %p597_p2, %p843_p12 }
 0x306   : > { %p603_p6 = por %p602_p0, %p601_p7 }
 0x307   : > { %p599_p9 = pneg %p598_p4 }
 0x309   : > { %p604_p11 = pnand %p603_p6, %p599_p9 }
 0x30b   : > { %607 = shalt.err (!%p604_p11)
}
 0x30c   : > { %500 = dma.vmem_to_hbm [thread:$0]  (%p843_p12), %s394_s11, 256, %s792_s20, %s379_s22  }
 0x30d PF: > { %s405_s23 = sand.u32 1, %s634_s12   ;;  %p844_p13 = scmp.ne.s32.totalorder %s838_s25, 0 }
 0x30e   : > { %p845_p1 = scmp.ge.s32.totalorder %s646_s15, 2  ;;  %s406_s8 = scalar_lea.sflag [#allocation4], %s405_s23 }
 0x310   : > { %p507_p3 = pnand %p845_p1, %p844_p13 }
 0x312   : > { %p508_p5 = pneg %p507_p3 }
 0x314   : > { %629 = dma.done.wait (%p508_p5), %s406_s8, 256  }
 0x315   : > { %631 = vsyncadd (%p508_p5), %s406_s8, 4294967040  ;;  %p16_p8 = scmp.ge.s32.totalorder %s697_s18, 4   ;;  %s846_s12 = smov %s638_s13 }
 0x316   : > { %s847_s13 = smov %s642_s14  ;;  %s848_s14 = smov %s709_s21 }
 0x317   : > { %s849_s15 = smov %s697_s18  ;;  %18 = sbr.rel (!%p16_p8) target bundleno = 5 (0x5), region = 77 }
 0x31c   :  { %411 = vsyncpa [#allocation3], 1 }
 0x31d   :  { %413 = vsyncpa [#allocation3 + $0x1], 1 }
 0x31e   :  { %414 = vsyncpa [#allocation4], 1 }
 0x31f   :  { %416 = vsyncpa [#allocation4 + $0x1], 1 }

</bundles_post_ra>
